<compile_context>
chip_gen: v6e
topology: v6e:2x2x1
jax: 0.10.0
libtpu: 0.0.40
codegen_flags: <defaults>
</compile_context>

<pallas_src>
import jax
import jax.numpy as jnp
from jax.experimental import pallas as pl
from jax.experimental.pallas import tpu as pltpu

NEG_BIG = -1e30  # "minus infinity" for padded softmax lanes (finite => no inf math)


def _round_up(n, m):
    return ((n + m - 1) // m) * m


def policy_net_kernel(x_ref, w1_ref, b1_ref, w2_ref, b2_ref, wh_ref, bh_ref, out_ref):
    """Fused forward: relu(x@W1+b1) -> relu(@W2+b2) -> @Wh+bh -> softmax(-1).

    Weights arrive as bf16; activations are cast to bf16 right before each MXU
    matmul and accumulated in f32.  Elementwise / softmax math stays in f32.
    """
    x = x_ref[...].astype(jnp.bfloat16)

    # body layer 1: Linear + ReLU  (MXU + VPU)
    h1 = jnp.dot(x, w1_ref[...], preferred_element_type=jnp.float32) + b1_ref[...]
    h1 = jnp.maximum(h1, 0.0)

    # body layer 2: Linear + ReLU
    h2 = jnp.dot(h1.astype(jnp.bfloat16), w2_ref[...],
                 preferred_element_type=jnp.float32) + b2_ref[...]
    h2 = jnp.maximum(h2, 0.0)

    # head: Linear on 128-padded (lane-dense) output columns
    logits = jnp.dot(h2.astype(jnp.bfloat16), wh_ref[...],
                     preferred_element_type=jnp.float32) + bh_ref[...]

    # numerically stable softmax over the padded last dim; pad lanes carry
    # logits of -1e30 so their probability underflows to exactly 0.
    # Exact divide (not approx reciprocal): rows sum to 1 at f32 precision and
    # the divide is hidden behind the matmuls / DMA (kernel is not EUP-bound).
    m = jnp.max(logits, axis=-1, keepdims=True)
    e = jnp.exp(logits - m)
    denom = jnp.sum(e, axis=-1, keepdims=True)
    out_ref[...] = (e / denom).astype(out_ref.dtype)


def policy_network_forward(x, params, *, block_b=512, out_dtype=jnp.float32):
    """Batch-tiled pallas_call with VMEM-resident weights and lane-dense output."""
    w1, b1, w2, b2, wh, bh = params
    B, I = x.shape
    H1 = w1.shape[1]
    H2 = w2.shape[1]
    O = wh.shape[1]

    # ---- lane-dense head: pad output dim to a multiple of 128 lanes ----------
    O_pad = _round_up(O, 128)
    if O_pad != O:
        wh = jnp.pad(wh, ((0, 0), (0, O_pad - O)))                       # zero cols
        bh = jnp.pad(bh, ((0, 0), (0, O_pad - O)), constant_values=NEG_BIG)

    # ---- bf16 weights: halve HBM->VMEM DMA bytes, MXU-native operands --------
    w1b = w1.astype(jnp.bfloat16)
    w2b = w2.astype(jnp.bfloat16)
    whb = wh.astype(jnp.bfloat16)

    # ---- batch tiling ---------------------------------------------------------
    # Large B: TB is a multiple of 128 (fills MXU M dim, amortizes per-step
    # overhead), shrunk so there are >= 2 grid steps (v7x dual-TC sharding).
    # Small B: single step, TB rounded to 16 rows (bf16 sublane packing).
    # Per-step VMEM ~ 2*TB*(I + O_pad)*4B double-buffered I/O + single-buffered
    # resident weights + TB*hidden intermediates: TB=512 stays far below the
    # 32 MiB scoped limit on every generation.
    if B <= block_b:
        TB = _round_up(max(B, 16), 16)
    else:
        TB = min(_round_up(block_b, 128), _round_up(-(-B // 2), 128))
    num_blocks = -(-B // TB)
    B_pad = num_blocks * TB
    grid = (num_blocks,)

    # Pad batch with zero rows so the tail grid step never computes softmax on
    # uninitialized data (zero rows give finite logits => no NaN/Inf anywhere).
    x_in = x if B_pad == B else jnp.pad(x, ((0, B_pad - B), (0, 0)))

    def resident(shape):
        # Constant index_map => same tile every step => no re-DMA. Buffered(1)
        # disables the (useless) double buffer and halves resident VMEM use.
        return pl.BlockSpec(shape, lambda i: (0, 0), pipeline_mode=pl.Buffered(1))

    out_itemsize = jnp.dtype(out_dtype).itemsize
    flops = 2 * B_pad * (I * H1 + H1 * H2 + H2 * O_pad)
    bytes_accessed = (
        x_in.size * x_in.dtype.itemsize
        + sum(a.size * a.dtype.itemsize for a in (w1b, w2b, whb, b1, b2, bh))
        + B_pad * O_pad * out_itemsize
    )
    cost = pl.CostEstimate(flops=flops, transcendentals=B_pad * O_pad,
                           bytes_accessed=bytes_accessed)

    out_padded = pl.pallas_call(
        policy_net_kernel,
        out_shape=jax.ShapeDtypeStruct((B_pad, O_pad), out_dtype),
        grid=grid,
        in_specs=[
            pl.BlockSpec((TB, I), lambda i: (i, 0)),   # x: tiled over batch
            resident((I, H1)),                         # W1 (resident in VMEM)
            resident((1, H1)),                         # b1
            resident((H1, H2)),                        # W2
            resident((1, H2)),                         # b2
            resident((H2, O_pad)),                     # Wh (padded, lane-dense)
            resident((1, O_pad)),                      # bh (padded with -1e30)
        ],
        out_specs=pl.BlockSpec((TB, O_pad), lambda i: (i, 0)),
        compiler_params=pltpu.CompilerParams(
            dimension_semantics=("parallel",),         # v7x: shard batch over 2 TCs
            vmem_limit_bytes=32 * 1024 * 1024,
        ),
        cost_estimate=cost,
    )(x_in, w1b, b1, w2b, b2, whb, bh)

    # TODO(synk): if the consumer can index a padded array, drop this slice to
    # save one HBM->HBM copy; kept here so the return shape matches nn.Module.
    return out_padded[:B, :O]


def init_params(key, input_dim, hidden_dim, output_dim):
    """Deterministic synthetic parameters (uniform, PyTorch-Linear-style scale)."""
    ks = jax.random.split(key, 6)

    def lin(kw, kb, fan_in, fan_out):
        bound = 1.0 / jnp.sqrt(fan_in)
        w = jax.random.uniform(kw, (fan_in, fan_out), jnp.float32, -bound, bound)
        b = jax.random.uniform(kb, (1, fan_out), jnp.float32, -bound, bound)
        return w, b

    w1, b1 = lin(ks[0], ks[1], input_dim, hidden_dim)
    w2, b2 = lin(ks[2], ks[3], hidden_dim, hidden_dim)
    wh, bh = lin(ks[4], ks[5], hidden_dim, output_dim)
    return (w1, b1, w2, b2, wh, bh)


def reference_forward(x, params):
    """Pure-JAX f32 reference of the same forward pass (correctness check)."""
    w1, b1, w2, b2, wh, bh = params
    h1 = jnp.maximum(x @ w1 + b1, 0.0)
    h2 = jnp.maximum(h1 @ w2 + b2, 0.0)
    logits = h2 @ wh + bh
    return jax.nn.softmax(logits, axis=-1)


if __name__ == "__main__":
    key = jax.random.PRNGKey(0)
    k_x, k_p = jax.random.split(key)

    batch, input_dim, hidden_dim, output_dim = 8, 32, 32, 8
    x = jax.random.normal(k_x, (batch, input_dim), dtype=jnp.float32)
    params = init_params(k_p, input_dim, hidden_dim, output_dim)

    out = jax.block_until_ready(policy_network_forward(x, params))
    ref = reference_forward(x, params)

    assert out.shape == (batch, output_dim)
    assert out.dtype == jnp.float32
    # rows of a softmax must sum to ~1 (exact divide => tight tolerance)
    assert jnp.allclose(jnp.sum(out, axis=-1), 1.0, atol=1e-3)
    # bf16 matmul operands vs f32 reference
    assert jnp.allclose(out, ref, atol=2e-2, rtol=2e-2)

    print("KERNEL_OK")
</pallas_src>

<mosaic_0001>
module attributes {stable_mosaic.version = 11 : i64} {
  func.func @policy_net_kernel(%arg0: i32, %arg1: memref<16x32xf32, #tpu.memory_space<vmem>>, %arg2: memref<32x32xbf16, #tpu.memory_space<vmem>>, %arg3: memref<1x32xf32, #tpu.memory_space<vmem>>, %arg4: memref<32x32xbf16, #tpu.memory_space<vmem>>, %arg5: memref<1x32xf32, #tpu.memory_space<vmem>>, %arg6: memref<32x128xbf16, #tpu.memory_space<vmem>>, %arg7: memref<1x128xf32, #tpu.memory_space<vmem>>, %arg8: memref<16x128xf32, #tpu.memory_space<vmem>>) attributes {dimension_semantics = [#tpu.dimension_semantics<parallel>], iteration_bounds = array<i64: 1>, scalar_prefetch = 0 : i64, scratch_operands = 0 : i64, tpu.core_type = #tpu.core_type<tc>, window_params = [{transform_indices = @transform_0, window_bounds = array<i64: 16, 32>}, {pipeline_mode = #tpu.pipeline_mode<synchronous>, transform_indices = @transform_1, window_bounds = array<i64: 32, 32>}, {pipeline_mode = #tpu.pipeline_mode<synchronous>, transform_indices = @transform_2, window_bounds = array<i64: 1, 32>}, {pipeline_mode = #tpu.pipeline_mode<synchronous>, transform_indices = @transform_3, window_bounds = array<i64: 32, 32>}, {pipeline_mode = #tpu.pipeline_mode<synchronous>, transform_indices = @transform_4, window_bounds = array<i64: 1, 32>}, {pipeline_mode = #tpu.pipeline_mode<synchronous>, transform_indices = @transform_5, window_bounds = array<i64: 32, 128>}, {pipeline_mode = #tpu.pipeline_mode<synchronous>, transform_indices = @transform_6, window_bounds = array<i64: 1, 128>}, {transform_indices = @transform_7, window_bounds = array<i64: 16, 128>}]} {
    %c0 = arith.constant 0 : index
    %c0_0 = arith.constant 0 : index
    %0 = vector.load %arg1[%c0, %c0_0] : memref<16x32xf32, #tpu.memory_space<vmem>>, vector<16x32xf32>
    %1 = arith.truncf %0 : vector<16x32xf32> to vector<16x32xbf16>
    %c0_1 = arith.constant 0 : index
    %c0_2 = arith.constant 0 : index
    %2 = vector.load %arg2[%c0_1, %c0_2] : memref<32x32xbf16, #tpu.memory_space<vmem>>, vector<32x32xbf16>
    %cst = arith.constant dense<0.000000e+00> : vector<16x32xf32>
    %3 = tpu.matmul %1, %2, %cst {dimension_numbers = #tpu.dot_dimension_numbers<[1], [0], [0], [1], [0, 0, 1, 1], [], []>} : vector<16x32xbf16>, vector<32x32xbf16>, vector<16x32xf32> -> vector<16x32xf32>
    %c0_3 = arith.constant 0 : index
    %c0_4 = arith.constant 0 : index
    %4 = vector.load %arg3[%c0_3, %c0_4] : memref<1x32xf32, #tpu.memory_space<vmem>>, vector<1x32xf32>
    %5 = vector.broadcast %4 : vector<1x32xf32> to vector<16x32xf32>
    %6 = arith.addf %3, %5 : vector<16x32xf32>
    %cst_5 = arith.constant 0.000000e+00 : f32
    %7 = vector.broadcast %cst_5 : f32 to vector<16x32xf32>
    %8 = arith.maximumf %6, %7 : vector<16x32xf32>
    %9 = arith.truncf %8 : vector<16x32xf32> to vector<16x32xbf16>
    %c0_6 = arith.constant 0 : index
    %c0_7 = arith.constant 0 : index
    %10 = vector.load %arg4[%c0_6, %c0_7] : memref<32x32xbf16, #tpu.memory_space<vmem>>, vector<32x32xbf16>
    %cst_8 = arith.constant dense<0.000000e+00> : vector<16x32xf32>
    %11 = tpu.matmul %9, %10, %cst_8 {dimension_numbers = #tpu.dot_dimension_numbers<[1], [0], [0], [1], [0, 0, 1, 1], [], []>} : vector<16x32xbf16>, vector<32x32xbf16>, vector<16x32xf32> -> vector<16x32xf32>
    %c0_9 = arith.constant 0 : index
    %c0_10 = arith.constant 0 : index
    %12 = vector.load %arg5[%c0_9, %c0_10] : memref<1x32xf32, #tpu.memory_space<vmem>>, vector<1x32xf32>
    %13 = vector.broadcast %12 : vector<1x32xf32> to vector<16x32xf32>
    %14 = arith.addf %11, %13 : vector<16x32xf32>
    %cst_11 = arith.constant 0.000000e+00 : f32
    %15 = vector.broadcast %cst_11 : f32 to vector<16x32xf32>
    %16 = arith.maximumf %14, %15 : vector<16x32xf32>
    %17 = arith.truncf %16 : vector<16x32xf32> to vector<16x32xbf16>
    %c0_12 = arith.constant 0 : index
    %c0_13 = arith.constant 0 : index
    %18 = vector.load %arg6[%c0_12, %c0_13] : memref<32x128xbf16, #tpu.memory_space<vmem>>, vector<32x128xbf16>
    %cst_14 = arith.constant dense<0.000000e+00> : vector<16x128xf32>
    %19 = tpu.matmul %17, %18, %cst_14 {dimension_numbers = #tpu.dot_dimension_numbers<[1], [0], [0], [1], [0, 0, 1, 1], [], []>} : vector<16x32xbf16>, vector<32x128xbf16>, vector<16x128xf32> -> vector<16x128xf32>
    %c0_15 = arith.constant 0 : index
    %c0_16 = arith.constant 0 : index
    %20 = vector.load %arg7[%c0_15, %c0_16] : memref<1x128xf32, #tpu.memory_space<vmem>>, vector<1x128xf32>
    %21 = vector.broadcast %20 : vector<1x128xf32> to vector<16x128xf32>
    %22 = arith.addf %19, %21 : vector<16x128xf32>
    %cst_17 = arith.constant dense<0xFF800000> : vector<16xf32>
    %23 = vector.multi_reduction <maximumf>, %22, %cst_17 [1] : vector<16x128xf32> to vector<16xf32>
    %24 = vector.shape_cast %23 : vector<16xf32> to vector<16x1xf32>
    %25 = vector.broadcast %24 : vector<16x1xf32> to vector<16x128xf32>
    %26 = arith.subf %22, %25 : vector<16x128xf32>
    %27 = math.exp %26 : vector<16x128xf32>
    %cst_18 = arith.constant dense<0.000000e+00> : vector<16xf32>
    %28 = vector.multi_reduction <add>, %27, %cst_18 [1] : vector<16x128xf32> to vector<16xf32>
    %29 = vector.shape_cast %28 : vector<16xf32> to vector<16x1xf32>
    %30 = vector.broadcast %29 : vector<16x1xf32> to vector<16x128xf32>
    %31 = arith.divf %27, %30 : vector<16x128xf32>
    %c0_19 = arith.constant 0 : index
    %c0_20 = arith.constant 0 : index
    %32 = vector.load %arg8[%c0_19, %c0_20] : memref<16x128xf32, #tpu.memory_space<vmem>>, vector<16x128xf32>
    tpu.vector_store %arg8[%c0_19, %c0_20], %31 {strides = array<i32>} : memref<16x128xf32, #tpu.memory_space<vmem>>, vector<16x128xf32>,
    return
  }
  func.func @transform_0(%arg0: i32) -> (i32, i32) {
    %c0_i32 = arith.constant 0 : i32
    %c0_i32_0 = arith.constant 0 : i32
    return %arg0, %c0_i32 : i32, i32
  }
  func.func @transform_1(%arg0: i32) -> (i32, i32) {
    %c0_i32 = arith.constant 0 : i32
    %c0_i32_0 = arith.constant 0 : i32
    %c0_i32_1 = arith.constant 0 : i32
    return %c0_i32, %c0_i32_0 : i32, i32
  }
  func.func @transform_2(%arg0: i32) -> (i32, i32) {
    %c0_i32 = arith.constant 0 : i32
    %c0_i32_0 = arith.constant 0 : i32
    %c0_i32_1 = arith.constant 0 : i32
    return %c0_i32, %c0_i32_0 : i32, i32
  }
  func.func @transform_3(%arg0: i32) -> (i32, i32) {
    %c0_i32 = arith.constant 0 : i32
    %c0_i32_0 = arith.constant 0 : i32
    %c0_i32_1 = arith.constant 0 : i32
    return %c0_i32, %c0_i32_0 : i32, i32
  }
  func.func @transform_4(%arg0: i32) -> (i32, i32) {
    %c0_i32 = arith.constant 0 : i32
    %c0_i32_0 = arith.constant 0 : i32
    %c0_i32_1 = arith.constant 0 : i32
    return %c0_i32, %c0_i32_0 : i32, i32
  }
  func.func @transform_5(%arg0: i32) -> (i32, i32) {
    %c0_i32 = arith.constant 0 : i32
    %c0_i32_0 = arith.constant 0 : i32
    %c0_i32_1 = arith.constant 0 : i32
    return %c0_i32, %c0_i32_0 : i32, i32
  }
  func.func @transform_6(%arg0: i32) -> (i32, i32) {
    %c0_i32 = arith.constant 0 : i32
    %c0_i32_0 = arith.constant 0 : i32
    %c0_i32_1 = arith.constant 0 : i32
    return %c0_i32, %c0_i32_0 : i32, i32
  }
  func.func @transform_7(%arg0: i32) -> (i32, i32) {
    %c0_i32 = arith.constant 0 : i32
    %c0_i32_0 = arith.constant 0 : i32
    return %arg0, %c0_i32 : i32, i32
  }
}

</mosaic_0001>

<bundles_post_ra>
// kernel: tpu_custom_call.1
= control target key start
LH: loop header
LB: loop body
LE: loop exit
PB: predicated region body
PF: predicated region fallthrough
CT: control target
= control target key end

     0   :  { %12 = vsyncpa [#allocation3], 0  ;;  %s604_s0 = inlined_call_operand.hbm [shape: f32[16,32], index: 0, kind: input, shape index: {}]   ;;  %s605_s1 = inlined_call_operand.hbm [shape: bf16[32,32], index: 1, kind: input, shape index: {}]   ;;  %s606_s2 = inlined_call_operand.vmem [shape: f32[1,32], index: 2, kind: input, shape index: {}]   ;;  %s607_s3 = inlined_call_operand.hbm [shape: bf16[32,32], index: 3, kind: input, shape index: {}]   ;;  %s608_s4 = inlined_call_operand.vmem [shape: f32[1,32], index: 4, kind: input, shape index: {}]   ;;  %s609_s5 = inlined_call_operand.hbm [shape: bf16[32,128], index: 5, kind: input, shape index: {}]   ;;  %s610_s6 = inlined_call_operand.vmem [shape: f32[1,128], index: 6, kind: input, shape index: {}]   ;;  %s611_s7 = inlined_call_operand.hbm [shape: f32[16,128], index: 7, kind: output, shape index: {}]  }
   0x1   :  { %13 = vsyncpa [#allocation6], 0 }
   0x2   :  { %14 = vsyncpa [#allocation9], 0 }
   0x3   :  { %15 = vsyncpa [#allocation4], 0  ;;  %s511_s24 = smov [#allocation5]  }
   0x4   :  { %s33_s25 = sshll.u32 %s511_s24, 4  ;;  %s34_s25 = int_to_ptr.vmem [resolvable:$true] %s33_s25 }
   0x5   :  { %s411_s26 = scalar_lea.vmem %s34_s25, 256  ;;  %p416_p1 = scmp.lt.s32.totalorder %s34_s25, %s34_s25 }
   0x6   :  { %p412_p0 = scmp.ne.s32.totalorder %s34_s25, %s411_s26  ;;  %p417_p2 = scmp.lt.s32.totalorder %s411_s26, %s411_s26 }
   0x8   :  { %p418_p3 = por %p417_p2, %p416_p1 }
   0xa   :  { %p419_p4 = pnand %p418_p3, %p412_p0 }
   0xc   :  { %422 = shalt.err (!%p419_p4)
}
   0xd   :  { %s512_s27 = smov 64   ;;  %s513_s28 = smov 4  }
   0xe   :  { %39 = dma.hbm_to_vmem [thread:$0]  %s605_s1, 256, %s34_s25, [#allocation6], %s512_s27, %s512_s27, %s513_s28  }
   0xf   :  { %s514_s8 = smov [#allocation2]  }
  0x10   :  { %s21_s9 = sshll.u32 %s514_s8, 4  ;;  %s22_s9 = int_to_ptr.vmem [resolvable:$true] %s21_s9 }
  0x11   :  { %s431_s10 = scalar_lea.vmem %s22_s9, 256  ;;  %p436_p6 = scmp.lt.s32.totalorder %s22_s9, %s22_s9 }
  0x12   :  { %p432_p5 = scmp.ne.s32.totalorder %s22_s9, %s431_s10  ;;  %p437_p7 = scmp.lt.s32.totalorder %s431_s10, %s431_s10 }
  0x14   :  { %p438_p8 = por %p437_p7, %p436_p6 }
  0x16   :  { %p439_p9 = pnand %p438_p8, %p432_p5 }
  0x18   :  { %442 = shalt.err (!%p439_p9)
}
  0x19   :  { %s515_s11 = smov 128   ;;  %s516_s12 = smov 8  }
  0x1a   :  { %27 = dma.hbm_to_vmem [thread:$0]  %s604_s0, 256, %s22_s9, [#allocation3], %s515_s11, %s515_s11, %s516_s12  }
  0x1b   :  { %s517_s1 = smov [#allocation7]   ;;  %s518_s16 = smov [#allocation8]  }
  0x1c   :  { %s47_s15 = sshll.u32 %s517_s1, 4  ;;  %s61_s17 = sshll.u32 %s518_s16, 4  ;;  %s48_s15 = int_to_ptr.vmem [resolvable:$true] %s47_s15  ;;  %s62_s17 = int_to_ptr.vmem [resolvable:$true] %s61_s17 }
  0x1d   :  { %s451_s18 = scalar_lea.vmem %s48_s15, 256  ;;  %p456_p11 = scmp.lt.s32.totalorder %s48_s15, %s48_s15 }
  0x1e   :  { %p452_p10 = scmp.ne.s32.totalorder %s48_s15, %s451_s18  ;;  %p457_p12 = scmp.lt.s32.totalorder %s451_s18, %s451_s18 }
  0x20   :  { %p458_p13 = por %p457_p12, %p456_p11 }
  0x22   :  { %p459_p0 = pnand %p458_p13, %p452_p10 }
  0x24   :  { %462 = shalt.err (!%p459_p0)
}
  0x25   :  { %53 = dma.hbm_to_vmem [thread:$0]  %s607_s3, 256, %s48_s15, [#allocation6], %s512_s27, %s512_s27, %s513_s28  }
  0x26   :  { %s471_s0 = scalar_lea.vmem %s62_s17, 256  ;;  %p476_p2 = scmp.lt.s32.totalorder %s62_s17, %s62_s17 }
  0x27   :  { %p472_p1 = scmp.ne.s32.totalorder %s62_s17, %s471_s0  ;;  %p477_p3 = scmp.lt.s32.totalorder %s471_s0, %s471_s0 }
  0x29   :  { %p478_p4 = por %p477_p3, %p476_p2 }
  0x2b   :  { %p479_p5 = pnand %p478_p4, %p472_p1 }
  0x2d   :  { %482 = shalt.err (!%p479_p5)
}
  0x2e   :  { %67 = dma.hbm_to_vmem [thread:$0]  %s609_s5, 256, %s62_s17, [#allocation9], %s512_s27, %s512_s27, %s513_s28  }
  0x2f   :  { %503 = dma.done.wait [#allocation3], 256  }
  0x30   :  { %504 = vsyncadd [#allocation3], 4294967040 }
  0x31   :  { %505 = dma.done.wait [#allocation6], 512  }
  0x32   :  { %506 = vsyncadd [#allocation6], 4294966784 }
  0x33   :  { %507 = dma.done.wait [#allocation9], 256  }
  0x34   :  { %508 = vsyncadd [#allocation9], 4294967040  ;;  %v519_v0 = vmov 0.0   ;;  %vm520_vm0 = vmmov 0   ;;  %v389_v1 = vld [vmem:[#allocation5 + $0x8] sm:$0xff]   ;;  %v390_v2 = vld [vmem:[#allocation5] sm:$0xff]  }
  0x35   :  { %354 = vmatprep.subr.bf16.mxu0 %v519_v0  ;;  %358 = vmatprep.mubr.msk.bf16.mxu0 %vm520_vm0, %v519_v0  ;;  %v83_v3 = vld [vmem:[#allocation2] sm:$0xff]  ;;  %v84_v4 = vld [vmem:[#allocation2 + $0x8] sm:$0xff]  ;;  %vm109_vm1 = vcmask 261120   ;;  %v393_v18 = vld [vmem:[#allocation8 + $0x8] sm:$0xff]  }
  0x36   :  { %362 = vmatprep.subr.bf16.mxu1 %v519_v0  ;;  %366 = vmatprep.mubr.msk.bf16.mxu1 %vm520_vm0, %v519_v0  ;;  %v85_v5 = vpack.c.bf16 %v84_v4, %v83_v3  ;;  %v391_v6 = vld [vmem:[#allocation7 + $0x8] sm:$0xff]   ;;  %v392_v7 = vld [vmem:[#allocation7] sm:$0xff]   ;;  %v394_v19 = vld [vmem:[#allocation8] sm:$0xff]  }
  0x37   :  { %355 = vmatpush3.bf16.msra.mxu0 %v389_v1  ;;  %363 = vmatpush3.bf16.msra.mxu1 %v391_v6  ;;  %v333_v8 = vld [vmem:[%s606_s2] ss:$0 sm:$0xff] }
  0x38   :  { %356 = vmatprep.subr.bf16.mxu0 %v519_v0  ;;  %364 = vmatprep.subr.bf16.mxu1 %v519_v0  ;;  %v337_v20 = vld [vmem:[%s608_s4] ss:$0 sm:$0xff]  ;;  %s521_s4 = smov [#allocation10]  }
  0x39   :  { %v341_v30 = vld [vmem:[%s610_s6] ss:$0 sm:$0xff]  ;;  %s319_s6 = sshll.u32 %s521_s4, 4  ;;  %s320_s6 = int_to_ptr.vmem [resolvable:$true] %s319_s6 }
  0x3a   :  { %s483_s26 = scalar_lea.vmem %s320_s6, 256  ;;  %p488_p7 = scmp.lt.s32.totalorder %s320_s6, %s320_s6 }
  0x3b   :  { %357 = vmatpush3.bf16.msra.mxu0 %v390_v2  ;;  %365 = vmatpush3.bf16.msra.mxu1 %v392_v7  ;;  %p484_p6 = scmp.ne.s32.totalorder %s320_s6, %s483_s26  ;;  %p489_p8 = scmp.lt.s32.totalorder %s483_s26, %s483_s26 }
  0x3c   :  { %370 = vmatprep.subr.bf16.mxu0 %v519_v0 }
  0x3d   :  { %p490_p9 = por %p489_p8, %p488_p7 }
  0x3e   :  { %359 = vmatmul.mubr.msk.bf16.vlgmr.msra.gmra.mxu0 %vm109_vm1, %v85_v5 }
  0x3f   :  { %374 = vmatprep.mubr.msk.bf16.mxu0 %vm520_vm0, %v519_v0  ;;  %371 = vmatpush3.bf16.msra.mxu0 %v393_v18  ;;  %p491_p10 = pnand %p490_p9, %p484_p6 }
  0x40   :  { %372 = vmatprep.subr.bf16.mxu0 %v519_v0 }
  0x43   :  { %373 = vmatpush3.bf16.msra.mxu0 %v394_v19 }
  0xfe   :  { %v147_v9 = vpop.f32.mrf.mxu0 }
  0xff   :  { %v148_v11 = vadd.f32 %v333_v8, %v147_v9 }
 0x100   :  { %v360_v10 = vpop.f32.mrf.mxu0 }
 0x101   :  { %v154_v15 = vmax.f32 %v148_v11, 0.0 }
 0x102   :  { %v150_v12 = vpop.f32.mrf.mxu0 }
 0x103   :  { %v151_v13 = vadd.f32 %v333_v8, %v150_v12 }
 0x104   :  { %v361_v14 = vpop.f32.mrf.mxu0 }
 0x105   :  { %v155_v16 = vmax.f32 %v151_v13, 0.0 }
 0x107   :  { %v156_v17 = vpack.c.bf16 %v155_v16, %v154_v15 }
 0x109   :  { %367 = vmatmul.mubr.msk.bf16.vlgmr.msra.gmra.mxu1 %vm109_vm1, %v156_v17 }
 0x1c9   :  { %v217_v21 = vpop.f32.mrf.mxu1 }
 0x1ca   :  { %v218_v23 = vadd.f32 %v337_v20, %v217_v21 }
 0x1cb   :  { %v368_v22 = vpop.f32.mrf.mxu1 }
 0x1cc   :  { %v224_v27 = vmax.f32 %v218_v23, 0.0 }
 0x1cd   :  { %v220_v24 = vpop.f32.mrf.mxu1 }
 0x1ce   :  { %v221_v25 = vadd.f32 %v337_v20, %v220_v24 }
 0x1cf   :  { %v369_v26 = vpop.f32.mrf.mxu1 }
 0x1d0   :  { %v225_v28 = vmax.f32 %v221_v25, 0.0 }
 0x1d2   :  { %v226_v29 = vpack.c.bf16 %v225_v28, %v224_v27 }
 0x1d4   :  { %375 = vmatmul.mubr.msk.bf16.vlgmr.msra.gmra.mxu0 %vm109_vm1, %v226_v29 }
 0x294   :  { %v287_v31 = vpop.f32.mrf.mxu0 }
 0x295   :  { %v288_v32 = vadd.f32 %v341_v30, %v287_v31 }
 0x296   :  { %v376_v33 = vpop.f32.mrf.mxu0 }
 0x297   :  { %294 = vmax.xlane.f32.xlu0 %v288_v32 }
 0x298   :  { %v290_v34 = vpop.f32.mrf.mxu0 }
 0x299   :  { %v291_v35 = vadd.f32 %v341_v30, %v290_v34 }
 0x29a   :  { %v377_v36 = vpop.f32.mrf.mxu0 }
 0x29b   :  { %296 = vmax.xlane.f32.xlu0 %v291_v35 }
 0x320   :  { %v295_v37 = vpop.xlane.xlu0 %294 }
 0x321   :  { %v298_v38 = vsub.f32 %v288_v32, %v295_v37 }
 0x323   :  { %v300_v39 = vmul.f32 1.442695, %v298_v38 }
 0x324   :  { %v297_v40 = vpop.xlane.xlu0 %296 }
 0x325   :  { %395 = vpow2.f32 %v300_v39  ;;  %v299_v41 = vsub.f32 %v291_v35, %v297_v40 }
 0x327   :  { %v302_v42 = vmul.f32 1.442695, %v299_v41 }
 0x329   :  { %397 = vpow2.f32 %v302_v42 }
 0x332   :  { %v396_v43 = vpop.eup %395 }
 0x333   :  { %304 = vadd.xlane.f32.xlu1 %v396_v43 }
 0x336   :  { %v398_v44 = vpop.eup %397 }
 0x337   :  { %306 = vadd.xlane.f32.xlu1 %v398_v44 }
 0x3bc   :  { %v305_v45 = vpop.xlane.xlu1 %304 }
 0x3bd   :  { %399 = vrcp.f32 %v305_v45 }
 0x3c0   :  { %v307_v46 = vpop.xlane.xlu1 %306 }
 0x3c1   :  { %401 = vrcp.f32 %v307_v46 }
 0x3ca   :  { %v400_v47 = vpop.eup %399 }
 0x3cb   :  { %v309_v48 = vmul.f32 %v400_v47, %v396_v43 }
 0x3cd   :  { %312 = vst [vmem:[#allocation10] sm:$0xff] %v309_v48 }
 0x3ce   :  { %v402_v49 = vpop.eup %401 }
 0x3cf   :  { %v311_v50 = vmul.f32 %v402_v49, %v398_v44 }
 0x3d1   :  { %313 = vst [vmem:[#allocation10 + $0x8] sm:$0xff] %v311_v50 }
 0x3d2   :  { %494 = shalt.err (!%p491_p10)
}
 0x3d3   :  { %325 = dma.vmem_to_hbm [thread:$0]  %s320_s6, 256, %s611_s7, [#allocation4], %s515_s11, %s515_s11, %s516_s12  }
 0x3d4   :  { %509 = dma.done.wait [#allocation4], 256  }
 0x3d5   :  { %510 = vsyncadd [#allocation4], 4294967040 }
 0x3d6   :  { %329 = vsyncpa [#allocation3], 1 }
 0x3d7   :  { %330 = vsyncpa [#allocation6], 1 }
 0x3d8   :  { %331 = vsyncpa [#allocation9], 1 }
 0x3d9   :  { %332 = vsyncpa [#allocation4], 1 }

</bundles_post_ra>
